<compile_context>
chip_gen: v6e
topology: v6e:2x2x1
jax: 0.10.0
libtpu: 0.0.40
codegen_flags: <defaults>
</compile_context>

<pallas_src>
import jax
import jax.numpy as jnp
from jax import lax
from jax.experimental import pallas as pl
from jax.experimental.pallas import tpu as pltpu

EPS = 1e-5  # PyTorch nn.LayerNorm default eps


def _round_up(n, m):
    return ((n + m - 1) // m) * m


def _prenorm_linear_kernel(x_ref, w_ref, fb_ref, o_ref):
    # x_ref : (tm, D)   token rows.  The last grid block may contain garbage
    #                   rows (partial block); LN + matmul are row-wise and the
    #                   corresponding output rows are masked on store.
    # w_ref : (D, Np)   weight with LayerNorm gamma folded in (bf16 by default)
    # fb_ref: (1, Np)   f32 bias with LayerNorm beta folded in
    # o_ref : (tm, Np)
    x = x_ref[...].astype(jnp.float32)
    d = x.shape[-1]
    inv_d = jnp.float32(1.0 / d)

    # Single-pass LayerNorm statistics: var = E[x^2] - mean^2.
    s1 = jnp.sum(x, axis=-1, keepdims=True)
    s2 = jnp.sum(x * x, axis=-1, keepdims=True)
    mean = s1 * inv_d
    var = jnp.maximum(s2 * inv_d - mean * mean, 0.0)
    xn = (x - mean) * lax.rsqrt(var + EPS)

    # bf16 x bf16 -> f32 accumulation on the MXU (or f32 if weight kept f32).
    out = jnp.dot(xn.astype(w_ref.dtype), w_ref[...],
                  preferred_element_type=jnp.float32)
    o_ref[...] = (out + fb_ref[...]).astype(o_ref.dtype)


def fold_prenorm_linear_params(gamma, beta, w, fb, *, weight_dtype=jnp.bfloat16):
    """Fold the LayerNorm affine into the linear layer.  Do this ONCE.

    LN_hat(x)*g + b -> W' = diag(g) @ W,  b' = b @ W + fb.
    The folded weight/bias are padded on the N axis to a multiple of 128 so
    kernel stores are lane-dense.  Call this outside any step/decode loop (or
    jit the whole model so XLA hoists it); re-folding per call re-reads the
    full DxN weight from HBM.

    If gamma has a large dynamic range and tighter accuracy vs an f32
    reference is needed, pass weight_dtype=jnp.float32.
    """
    D, N = w.shape
    wf = w.astype(jnp.float32)
    w_folded = gamma.astype(jnp.float32)[:, None] * wf
    fb_folded = beta.astype(jnp.float32) @ wf + fb.astype(jnp.float32)

    Np = _round_up(N, 128)
    if Np != N:
        w_folded = jnp.pad(w_folded, ((0, 0), (0, Np - N)))
        fb_folded = jnp.pad(fb_folded, (0, Np - N))
    return w_folded.astype(weight_dtype), fb_folded.reshape(1, Np), N


def prenorm_linear_apply(x, w_p, fb_p, n_out, *, tm=512):
    """out = LayerNorm(x) @ W + b with pre-folded (w_p, fb_p).

    x: (B, S, D); w_p: (D, Np) (gamma folded, Np = round_up(n_out, 128));
    fb_p: (1, Np) (beta folded); returns (B, S, n_out) in x.dtype.
    """
    B, S, D = x.shape
    Dw, Np = w_p.shape
    assert Dw == D
    out_dtype = x.dtype

    R = B * S
    # Large row tiles amortize the ~0.35us/step pipeline overhead; clamp to
    # the problem size (rounded to a sublane multiple) for tiny inputs.
    tm_eff = min(tm, _round_up(R, 8))
    num_blocks = pl.cdiv(R, tm_eff)  # partial last block handled by Pallas

    x2 = x.reshape(R, D)  # no copy, no padding

    # Actual VMEM need: double-buffered x/out tiles, single-buffered weight
    # and bias, plus headroom for Mosaic internal scratch.  Never request the
    # whole physical VMEM (v7x has only 64 MiB per TC).
    need = (2 * tm_eff * D * x.dtype.itemsize
            + 2 * tm_eff * Np * jnp.dtype(out_dtype).itemsize
            + D * Np * w_p.dtype.itemsize
            + Np * 4)
    vmem_limit = int(min(need * 3 // 2 + (4 << 20), 48 << 20))

    out2 = pl.pallas_call(
        _prenorm_linear_kernel,
        out_shape=jax.ShapeDtypeStruct((R, Np), out_dtype),
        grid_spec=pl.GridSpec(
            grid=(num_blocks,),
            in_specs=[
                # x rows: streamed / double-buffered.
                pl.BlockSpec((tm_eff, D), lambda i: (i, 0)),
                # Folded weight & bias: grid-invariant -> single buffer.
                pl.BlockSpec((D, Np), lambda i: (0, 0),
                             pipeline_mode=pl.Buffered(1)),
                pl.BlockSpec((1, Np), lambda i: (0, 0),
                             pipeline_mode=pl.Buffered(1)),
            ],
            out_specs=pl.BlockSpec((tm_eff, Np), lambda i: (i, 0)),
        ),
        compiler_params=pltpu.CompilerParams(
            dimension_semantics=("parallel",),  # megacore-shard the row axis
            vmem_limit_bytes=vmem_limit,
        ),
    )(x2, w_p, fb_p)

    if Np != n_out:
        out2 = out2[:, :n_out]
    return out2.reshape(B, S, n_out)


def prenorm_linear(x, gamma, beta, w, fb, *, tm=512, weight_dtype=jnp.bfloat16):
    """One-shot convenience: fold + apply.  For repeated calls (decode loops),
    call fold_prenorm_linear_params once and reuse with prenorm_linear_apply."""
    w_p, fb_p, n_out = fold_prenorm_linear_params(
        gamma, beta, w, fb, weight_dtype=weight_dtype)
    return prenorm_linear_apply(x, w_p, fb_p, n_out, tm=tm)


def _reference(x, gamma, beta, w, fb):
    xf = x.astype(jnp.float32)
    mean = jnp.mean(xf, axis=-1, keepdims=True)
    var = jnp.mean((xf - mean) ** 2, axis=-1, keepdims=True)
    xn = (xf - mean) / jnp.sqrt(var + EPS)
    y = xn * gamma + beta
    return y @ w + fb


def _run_case(key, B, S, D, N, atol, rtol):
    kx, kg, kb, kw, kfb = jax.random.split(key, 5)
    x = jax.random.normal(kx, (B, S, D), dtype=jnp.float32)
    gamma = 1.0 + 0.1 * jax.random.normal(kg, (D,), dtype=jnp.float32)
    beta = 0.1 * jax.random.normal(kb, (D,), dtype=jnp.float32)
    w = jax.random.normal(kw, (D, N), dtype=jnp.float32) / jnp.sqrt(D)
    fb = 0.1 * jax.random.normal(kfb, (N,), dtype=jnp.float32)

    # Fold once (hoisted out of the per-call path), then apply.
    w_p, fb_p, n_out = fold_prenorm_linear_params(gamma, beta, w, fb)
    out = jax.block_until_ready(prenorm_linear_apply(x, w_p, fb_p, n_out))

    ref = _reference(x, gamma, beta, w, fb)
    # bf16 MXU operands + folded affine -> relaxed tolerance vs f32 reference.
    assert jnp.allclose(out, ref, atol=atol, rtol=rtol), (
        f"mismatch vs reference for shape {(B, S, D, N)}"
    )


if __name__ == "__main__":
    key = jax.random.PRNGKey(0)
    k0, k1 = jax.random.split(key, 2)

    # Main case: lane-dense dim (multiple of 128), exact row tiling.
    _run_case(k0, B=2, S=8, D=128, N=128, atol=3e-2, rtol=3e-2)
    # Ragged case: exercises partial row block (R=14) and unpadded D=96 /
    # N-padded (96 -> 128) output path.
    _run_case(k1, B=2, S=7, D=96, N=96, atol=3e-2, rtol=3e-2)

    print("KERNEL_OK")
</pallas_src>

<mosaic_0001>
module attributes {stable_mosaic.version = 11 : i64} {
  func.func @_prenorm_linear_kernel(%arg0: i32, %arg1: memref<16x128xf32, #tpu.memory_space<vmem>>, %arg2: memref<128x128xbf16, #tpu.memory_space<vmem>>, %arg3: memref<1x128xf32, #tpu.memory_space<vmem>>, %arg4: memref<16x128xf32, #tpu.memory_space<vmem>>) attributes {dimension_semantics = [#tpu.dimension_semantics<parallel>], iteration_bounds = array<i64: 1>, scalar_prefetch = 0 : i64, scratch_operands = 0 : i64, tpu.core_type = #tpu.core_type<tc>, window_params = [{transform_indices = @transform_0, window_bounds = array<i64: 16, 128>}, {pipeline_mode = #tpu.pipeline_mode<synchronous>, transform_indices = @transform_1, window_bounds = array<i64: 128, 128>}, {pipeline_mode = #tpu.pipeline_mode<synchronous>, transform_indices = @transform_2, window_bounds = array<i64: 1, 128>}, {transform_indices = @transform_3, window_bounds = array<i64: 16, 128>}]} {
    %c0 = arith.constant 0 : index
    %c0_0 = arith.constant 0 : index
    %0 = vector.load %arg1[%c0, %c0_0] : memref<16x128xf32, #tpu.memory_space<vmem>>, vector<16x128xf32>
    %cst = arith.constant dense<0.000000e+00> : vector<16xf32>
    %1 = vector.multi_reduction <add>, %0, %cst [1] : vector<16x128xf32> to vector<16xf32>
    %2 = vector.shape_cast %1 : vector<16xf32> to vector<16x1xf32>
    %3 = arith.mulf %0, %0 : vector<16x128xf32>
    %cst_1 = arith.constant dense<0.000000e+00> : vector<16xf32>
    %4 = vector.multi_reduction <add>, %3, %cst_1 [1] : vector<16x128xf32> to vector<16xf32>
    %5 = vector.shape_cast %4 : vector<16xf32> to vector<16x1xf32>
    %cst_2 = arith.constant 7.812500e-03 : f32
    %6 = vector.broadcast %cst_2 : f32 to vector<16x1xf32>
    %7 = arith.mulf %2, %6 : vector<16x1xf32>
    %cst_3 = arith.constant 7.812500e-03 : f32
    %8 = vector.broadcast %cst_3 : f32 to vector<16x1xf32>
    %9 = arith.mulf %5, %8 : vector<16x1xf32>
    %10 = arith.mulf %7, %7 : vector<16x1xf32>
    %11 = arith.subf %9, %10 : vector<16x1xf32>
    %cst_4 = arith.constant 0.000000e+00 : f32
    %12 = vector.broadcast %cst_4 : f32 to vector<16x1xf32>
    %13 = arith.maximumf %11, %12 : vector<16x1xf32>
    %14 = vector.broadcast %7 : vector<16x1xf32> to vector<16x128xf32>
    %15 = arith.subf %0, %14 : vector<16x128xf32>
    %cst_5 = arith.constant 9.99999974E-6 : f32
    %16 = vector.broadcast %cst_5 : f32 to vector<16x1xf32>
    %17 = arith.addf %13, %16 : vector<16x1xf32>
    %18 = math.rsqrt %17 : vector<16x1xf32>
    %19 = vector.broadcast %18 : vector<16x1xf32> to vector<16x128xf32>
    %20 = arith.mulf %15, %19 : vector<16x128xf32>
    %21 = arith.truncf %20 : vector<16x128xf32> to vector<16x128xbf16>
    %c0_6 = arith.constant 0 : index
    %c0_7 = arith.constant 0 : index
    %22 = vector.load %arg2[%c0_6, %c0_7] : memref<128x128xbf16, #tpu.memory_space<vmem>>, vector<128x128xbf16>
    %cst_8 = arith.constant dense<0.000000e+00> : vector<16x128xf32>
    %23 = tpu.matmul %21, %22, %cst_8 {dimension_numbers = #tpu.dot_dimension_numbers<[1], [0], [0], [1], [0, 0, 1, 1], [], []>} : vector<16x128xbf16>, vector<128x128xbf16>, vector<16x128xf32> -> vector<16x128xf32>
    %c0_9 = arith.constant 0 : index
    %c0_10 = arith.constant 0 : index
    %24 = vector.load %arg3[%c0_9, %c0_10] : memref<1x128xf32, #tpu.memory_space<vmem>>, vector<1x128xf32>
    %25 = vector.broadcast %24 : vector<1x128xf32> to vector<16x128xf32>
    %26 = arith.addf %23, %25 : vector<16x128xf32>
    %c0_11 = arith.constant 0 : index
    %c0_12 = arith.constant 0 : index
    %27 = vector.load %arg4[%c0_11, %c0_12] : memref<16x128xf32, #tpu.memory_space<vmem>>, vector<16x128xf32>
    tpu.vector_store %arg4[%c0_11, %c0_12], %26 {strides = array<i32>} : memref<16x128xf32, #tpu.memory_space<vmem>>, vector<16x128xf32>,
    return
  }
  func.func @transform_0(%arg0: i32) -> (i32, i32) {
    %c0_i32 = arith.constant 0 : i32
    %c0_i32_0 = arith.constant 0 : i32
    return %arg0, %c0_i32 : i32, i32
  }
  func.func @transform_1(%arg0: i32) -> (i32, i32) {
    %c0_i32 = arith.constant 0 : i32
    %c0_i32_0 = arith.constant 0 : i32
    %c0_i32_1 = arith.constant 0 : i32
    return %c0_i32, %c0_i32_0 : i32, i32
  }
  func.func @transform_2(%arg0: i32) -> (i32, i32) {
    %c0_i32 = arith.constant 0 : i32
    %c0_i32_0 = arith.constant 0 : i32
    %c0_i32_1 = arith.constant 0 : i32
    return %c0_i32, %c0_i32_0 : i32, i32
  }
  func.func @transform_3(%arg0: i32) -> (i32, i32) {
    %c0_i32 = arith.constant 0 : i32
    %c0_i32_0 = arith.constant 0 : i32
    return %arg0, %c0_i32 : i32, i32
  }
}

</mosaic_0001>

<bundles_post_ra>
// kernel: tpu_custom_call.1
= control target key start
LH: loop header
LB: loop body
LE: loop exit
PB: predicated region body
PF: predicated region fallthrough
CT: control target
= control target key end

     0   :  { %8 = vsyncpa [#allocation3], 0  ;;  %s379_s0 = inlined_call_operand.hbm [shape: f32[16,128], index: 0, kind: input, shape index: {}]   ;;  %s380_s1 = inlined_call_operand.hbm [shape: bf16[128,128], index: 1, kind: input, shape index: {}]   ;;  %s381_s2 = inlined_call_operand.vmem [shape: f32[1,128], index: 2, kind: input, shape index: {}]   ;;  %s382_s3 = inlined_call_operand.hbm [shape: f32[16,128], index: 3, kind: output, shape index: {}]  }
   0x1   :  { %9 = vsyncpa [#allocation6], 0 }
   0x2   :  { %10 = vsyncpa [#allocation4], 0  ;;  %s332_s12 = smov [#allocation2]  }
   0x3   :  { %s16_s13 = sshll.u32 %s332_s12, 4  ;;  %s17_s13 = int_to_ptr.vmem [resolvable:$true] %s16_s13 }
   0x4   :  { %s274_s14 = scalar_lea.vmem %s17_s13, 256  ;;  %p279_p1 = scmp.lt.s32.totalorder %s17_s13, %s17_s13 }
   0x5   :  { %p275_p0 = scmp.ne.s32.totalorder %s17_s13, %s274_s14  ;;  %p280_p2 = scmp.lt.s32.totalorder %s274_s14, %s274_s14 }
   0x7   :  { %p281_p3 = por %p280_p2, %p279_p1 }
   0x9   :  { %p282_p4 = pnand %p281_p3, %p275_p0 }
   0xb   :  { %285 = shalt.err (!%p282_p4)
}
   0xc   :  { %s333_s15 = smov 128   ;;  %s334_s16 = smov 8  }
   0xd   :  { %22 = dma.hbm_to_vmem [thread:$0]  %s379_s0, 256, %s17_s13, [#allocation3], %s333_s15, %s333_s15, %s334_s16  }
   0xe   :  { %s335_s19 = smov [#allocation5]  }
   0xf   :  { %s28_s20 = sshll.u32 %s335_s19, 4  ;;  %s29_s20 = int_to_ptr.vmem [resolvable:$true] %s28_s20 }
  0x10   :  { %s294_s21 = scalar_lea.vmem %s29_s20, 1024  ;;  %p299_p6 = scmp.lt.s32.totalorder %s29_s20, %s29_s20 }
  0x11   :  { %p295_p5 = scmp.ne.s32.totalorder %s29_s20, %s294_s21  ;;  %p300_p7 = scmp.lt.s32.totalorder %s294_s21, %s294_s21 }
  0x13   :  { %p301_p8 = por %p300_p7, %p299_p6 }
  0x15   :  { %p302_p9 = pnand %p301_p8, %p295_p5 }
  0x17   :  { %305 = shalt.err (!%p302_p9)
}
  0x18   :  { %s336_s22 = smov 64   ;;  %s337_s23 = smov 4  }
  0x19   :  { %34 = dma.hbm_to_vmem [thread:$0]  %s380_s1, 1024, %s29_s20, [#allocation6], %s336_s22, %s336_s22, %s337_s23  }
  0x1a   :  { %326 = dma.done.wait [#allocation3], 256  }
  0x1b   :  { %327 = vsyncadd [#allocation3], 4294967040 }
  0x1c   :  { %328 = dma.done.wait [#allocation6], 1024  }
  0x1d   :  { %329 = vsyncadd [#allocation6], 4294966272  ;;  %v44_v0 = vld [vmem:[#allocation2] sm:$0xff]  ;;  %v45_v1 = vld [vmem:[#allocation2 + $0x8] sm:$0xff]  ;;  %v338_v5 = vmov 0.0   ;;  %vm339_vm0 = vmmov 0  }
  0x1e   :  { %46 = vadd.xlane.f32.xlu0 %v44_v0  ;;  %v50_v2 = vmul.f32 %v44_v0, %v44_v0  ;;  %v51_v3 = vmul.f32 %v45_v1, %v45_v1  ;;  %v254_v4 = vld [vmem:[#allocation5 + $0x38] sm:$0xff]   ;;  %225 = vmatprep.subr.bf16.mxu0 %v338_v5  ;;  %v255_v6 = vld [vmem:[#allocation5 + $0x30] sm:$0xff]   ;;  %v256_v7 = vld [vmem:[#allocation5 + $0x28] sm:$0xff]   ;;  %s340_s26 = smov [#allocation7]  }
  0x1f   :  { %226 = vmatpush3.bf16.msra.mxu0 %v254_v4  ;;  %v257_v8 = vld [vmem:[#allocation5 + $0x20] sm:$0xff]   ;;  %v258_v9 = vld [vmem:[#allocation5 + $0x18] sm:$0xff]   ;;  %241 = vmatprep.mubr.msk.bf16.mxu0 %vm339_vm0, %v338_v5  ;;  %v259_v10 = vld [vmem:[#allocation5 + $0x10] sm:$0xff]   ;;  %s194_s27 = sshll.u32 %s340_s26, 4  ;;  %s195_s27 = int_to_ptr.vmem [resolvable:$true] %s194_s27 }
  0x20   :  { %52 = vadd.xlane.f32.xlu1 %v50_v2  ;;  %227 = vmatprep.subr.bf16.mxu0 %v338_v5  ;;  %v260_v11 = vld [vmem:[#allocation5 + $0x8] sm:$0xff]   ;;  %v261_v12 = vld [vmem:[#allocation5] sm:$0xff]   ;;  %v207_v36 = vld [vmem:[%s381_s2] ss:$0 sm:$0xff]  ;;  %s306_s28 = scalar_lea.vmem %s195_s27, 256  ;;  %p311_p11 = scmp.lt.s32.totalorder %s195_s27, %s195_s27 }
  0x21   :  { %p307_p10 = scmp.ne.s32.totalorder %s195_s27, %s306_s28  ;;  %p312_p12 = scmp.lt.s32.totalorder %s306_s28, %s306_s28 }
  0x22   :  { %48 = vadd.xlane.f32.xlu0 %v45_v1 }
  0x23   :  { %228 = vmatpush3.bf16.msra.mxu0 %v255_v6  ;;  %p313_p13 = por %p312_p12, %p311_p11 }
  0x24   :  { %54 = vadd.xlane.f32.xlu1 %v51_v3  ;;  %229 = vmatprep.subr.bf16.mxu0 %v338_v5 }
  0x25   :  { %p314_p0 = pnand %p313_p13, %p307_p10 }
  0x27   :  { %230 = vmatpush3.bf16.msra.mxu0 %v256_v7 }
  0x28   :  { %231 = vmatprep.subr.bf16.mxu0 %v338_v5 }
  0x2b   :  { %232 = vmatpush3.bf16.msra.mxu0 %v257_v8 }
  0x2c   :  { %233 = vmatprep.subr.bf16.mxu0 %v338_v5 }
  0x2f   :  { %234 = vmatpush3.bf16.msra.mxu0 %v258_v9 }
  0x30   :  { %235 = vmatprep.subr.bf16.mxu0 %v338_v5 }
  0x33   :  { %236 = vmatpush3.bf16.msra.mxu0 %v259_v10 }
  0x34   :  { %237 = vmatprep.subr.bf16.mxu0 %v338_v5 }
  0x37   :  { %238 = vmatpush3.bf16.msra.mxu0 %v260_v11 }
  0x38   :  { %239 = vmatprep.subr.bf16.mxu0 %v338_v5 }
  0x3b   :  { %240 = vmatpush3.bf16.msra.mxu0 %v261_v12 }
  0xa7   :  { %v47_v13 = vpop.xlane.xlu0 %46 }
  0xa8   :  { %v56_v14 = vmul.f32 0.0078125, %v47_v13 }
  0xa9   :  { %v53_v15 = vpop.xlane.xlu1 %52 }
  0xaa   :  { %v60_v16 = vmul.f32 %v56_v14, %v56_v14  ;;  %v58_v17 = vmul.f32 0.0078125, %v53_v15  ;;  %v66_v30 = vsub.f32 %v44_v0, %v56_v14 }
  0xab   :  { %v49_v18 = vpop.xlane.xlu0 %48 }
  0xac   :  { %v62_v19 = vsub.f32 %v58_v17, %v60_v16  ;;  %v57_v20 = vmul.f32 0.0078125, %v49_v18 }
  0xad   :  { %v55_v21 = vpop.xlane.xlu1 %54 }
  0xae   :  { %v64_v22 = vmax.f32 %v62_v19, 0.0  ;;  %v61_v23 = vmul.f32 %v57_v20, %v57_v20  ;;  %v59_v24 = vmul.f32 0.0078125, %v55_v21  ;;  %v67_v31 = vsub.f32 %v45_v1, %v57_v20 }
  0xb0   :  { %v68_v25 = vadd.f32 1e-05, %v64_v22  ;;  %v63_v26 = vsub.f32 %v59_v24, %v61_v23 }
  0xb2   :  { %v65_v27 = vmax.f32 %v63_v26, 0.0  ;;  %262 = vrsqrt.f32 %v68_v25 }
  0xb4   :  { %v69_v28 = vadd.f32 1e-05, %v65_v27 }
  0xb6   :  { %264 = vrsqrt.f32 %v69_v28 }
  0xbf   :  { %v263_v29 = vpop.eup %262 }
  0xc0   :  { %v72_v33 = vmul.f32 %v263_v29, %v66_v30 }
  0xc3   :  { %v265_v32 = vpop.eup %264 }
  0xc4   :  { %v73_v34 = vmul.f32 %v265_v32, %v67_v31 }
  0xc6   :  { %v74_v35 = vpack.c.bf16 %v73_v34, %v72_v33 }
  0xc8   :  { %242 = vmatmul.mubr.bf16.vlgmr.msra.gmra.mxu0 %v74_v35 }
 0x188   :  { %v180_v37 = vpop.f32.mrf.mxu0 }
 0x189   :  { %v181_v38 = vadd.f32 %v207_v36, %v180_v37 }
 0x18a   :  { %v243_v39 = vpop.f32.mrf.mxu0 }
 0x18b   :  { %187 = vst [vmem:[#allocation7] sm:$0xff] %v181_v38 }
 0x18c   :  { %v183_v40 = vpop.f32.mrf.mxu0 }
 0x18d   :  { %v184_v41 = vadd.f32 %v207_v36, %v183_v40 }
 0x18e   :  { %v244_v42 = vpop.f32.mrf.mxu0 }
 0x18f   :  { %188 = vst [vmem:[#allocation7 + $0x8] sm:$0xff] %v184_v41 }
 0x190   :  { %317 = shalt.err (!%p314_p0)
}
 0x191   :  { %200 = dma.vmem_to_hbm [thread:$0]  %s195_s27, 256, %s382_s3, [#allocation4], %s333_s15, %s333_s15, %s334_s16  }
 0x192   :  { %330 = dma.done.wait [#allocation4], 256  }
 0x193   :  { %331 = vsyncadd [#allocation4], 4294967040 }
 0x194   :  { %204 = vsyncpa [#allocation3], 1 }
 0x195   :  { %205 = vsyncpa [#allocation6], 1 }
 0x196   :  { %206 = vsyncpa [#allocation4], 1 }

</bundles_post_ra>
